<compile_context>
chip_gen: v5e
topology: v5e:2x2
jax: 0.10.0
libtpu: 0.0.40
codegen_flags: <defaults>
</compile_context>

<pallas_src>
import functools
import math

import jax
import jax.numpy as jnp
from jax.experimental import pallas as pl
from jax.experimental.pallas import tpu as pltpu


def _round_up(n, m):
    return ((n + m - 1) // m) * m


def _pick_col_tile(n, target=512, align=128):
    """Largest multiple of `align` <= target that divides n, else n itself."""
    if n <= target:
        return n
    for t in range(target, align - 1, -align):
        if n % t == 0:
            return t
    return n


# --------------------------- linear (matmul + bias) --------------------------

def _linear_kernel(x_ref, w_ref, b_ref, o_ref):
    # x_ref: (tm, Cin); w_ref: (Cin, tn); b_ref: (1, tn) f32; o_ref: (tm, tn).
    acc = jnp.dot(x_ref[...], w_ref[...], preferred_element_type=jnp.float32)
    o_ref[...] = (acc + b_ref[...]).astype(o_ref.dtype)


def _linear_pallas(x2, w, b, *, row_tile=256, col_tile=512, out_dtype=None):
    """x2: (rows, Cin); w: (Cin, Cout); b: (Cout,). Returns (rows, Cout)."""
    rows, cin = x2.shape
    cout = w.shape[1]
    out_dtype = x2.dtype if out_dtype is None else out_dtype

    tm = min(row_tile, _round_up(rows, 8))
    rows_p = _round_up(rows, tm)
    if rows_p != rows:
        x2 = jnp.pad(x2, ((0, rows_p - rows), (0, 0)))
    tn = _pick_col_tile(cout, col_tile)

    b2 = b.reshape(1, cout).astype(jnp.float32)

    n_i = rows_p // tm
    n_j = cout // tn
    bytes_accessed = (rows_p * cin * x2.dtype.itemsize * n_j       # x re-read per cout tile
                      + cin * cout * w.dtype.itemsize * n_i        # w re-read per row tile
                      + cout * 4
                      + rows_p * cout * jnp.dtype(out_dtype).itemsize)

    out = pl.pallas_call(
        _linear_kernel,
        out_shape=jax.ShapeDtypeStruct((rows_p, cout), out_dtype),
        grid_spec=pltpu.PrefetchScalarGridSpec(
            num_scalar_prefetch=0,
            grid=(n_i, n_j),
            in_specs=[
                pl.BlockSpec((tm, cin), lambda i, j: (i, 0)),    # activation rows
                pl.BlockSpec((cin, tn), lambda i, j: (0, j)),    # weight column tile
                pl.BlockSpec((1, tn), lambda i, j: (0, j)),      # bias tile
            ],
            out_specs=pl.BlockSpec((tm, tn), lambda i, j: (i, j)),
        ),
        compiler_params=pltpu.CompilerParams(
            dimension_semantics=("parallel", "parallel"),
            vmem_limit_bytes=32 * 1024 * 1024,
        ),
        cost_estimate=pl.CostEstimate(
            flops=2 * rows_p * cin * cout,
            transcendentals=0,
            bytes_accessed=int(bytes_accessed),
        ),
    )(x2, w, b2)

    if rows_p != rows:
        out = out[:rows]
    return out


# ------------------------- flash-style causal attention ----------------------

def _flash_attn_kernel(q_ref, k_ref, v_ref, o_ref, m_sc, l_sc, acc_sc, *,
                       sm_scale, hd, G):
    # q_ref: (1, tq, G*hd); k_ref/v_ref: (1, tk, G*hd); o_ref: (1, tq, G*hd).
    # Scratch: m_sc/l_sc: (G, tq, 1) f32; acc_sc: (G, tq, hd) f32.
    tq = q_ref.shape[1]
    tk = k_ref.shape[1]
    qi = pl.program_id(2)
    ki = pl.program_id(3)
    q_start = qi * tq
    k_start = ki * tk

    @pl.when(ki == 0)
    def _():
        m_sc[...] = jnp.full_like(m_sc, -jnp.inf)
        l_sc[...] = jnp.zeros_like(l_sc)
        acc_sc[...] = jnp.zeros_like(acc_sc)

    def _process(apply_mask):
        q = q_ref[0]            # (tq, G*hd)
        k = k_ref[0]            # (tk, G*hd)
        v = v_ref[0]            # (tk, G*hd)
        if apply_mask:
            row = q_start + jax.lax.broadcasted_iota(jnp.int32, (tq, tk), 0)
            col = k_start + jax.lax.broadcasted_iota(jnp.int32, (tq, tk), 1)
            keep = col <= row
        for h in range(G):      # static loop over heads packed in this lane slab
            sl = slice(h * hd, (h + 1) * hd)
            s = jax.lax.dot_general(q[:, sl], k[:, sl], (((1,), (1,)), ((), ())),
                                    preferred_element_type=jnp.float32)
            s = s * sm_scale
            if apply_mask:
                s = jnp.where(keep, s, -jnp.inf)
            m_prev = m_sc[h]                                    # (tq, 1)
            m_new = jnp.maximum(m_prev, s.max(axis=-1, keepdims=True))
            alpha = jnp.exp(m_prev - m_new)
            p = jnp.exp(s - m_new)
            l_sc[h] = alpha * l_sc[h] + p.sum(axis=-1, keepdims=True)
            acc_sc[h] = alpha * acc_sc[h] + jnp.dot(
                p.astype(v.dtype), v[:, sl], preferred_element_type=jnp.float32)
            m_sc[h] = m_new

    # Tiles entirely below the diagonal need no mask; the diagonal tile does.
    # Tiles strictly above the diagonal are skipped (their DMAs are already
    # suppressed by the clamped index_map in the wrapper).
    fully_below = (k_start + tk - 1) <= q_start
    on_diagonal = jnp.logical_and(k_start <= q_start + tq - 1,
                                  (k_start + tk - 1) > q_start)

    @pl.when(fully_below)
    def _():
        _process(apply_mask=False)

    @pl.when(on_diagonal)
    def _():
        _process(apply_mask=True)

    @pl.when(ki == pl.num_programs(3) - 1)
    def _():
        parts = []
        for h in range(G):
            inv = pl.reciprocal(l_sc[h], approx=True)           # EUP slot
            parts.append(acc_sc[h] * inv)
        out = parts[0] if G == 1 else jnp.concatenate(parts, axis=-1)
        o_ref[0] = out.astype(o_ref.dtype)


def _flash_attention_pallas(qkv, n_head, *, q_tile=256, kv_tile=256,
                            out_dtype=None):
    """qkv: (B, T, 3C) with columns [Q | K | V], heads contiguous inside each.

    Returns y: (B, T, C) with heads re-interleaved in the natural (T, C) layout
    (same layout the output projection expects), so no transposes are needed.
    """
    B, T, C3 = qkv.shape
    C = C3 // 3
    hd = C // n_head
    out_dtype = qkv.dtype if out_dtype is None else out_dtype

    # Pack heads into 128-lane groups (G heads per grid step) when possible.
    if hd < 128 and (128 % hd == 0) and (n_head % (128 // hd) == 0):
        G = 128 // hd
    else:
        G = 1
    LW = G * hd              # lane width of each q/k/v/o block
    ng = n_head // G         # number of head groups (column blocks per section)

    tq = min(q_tile, _round_up(T, 8))
    tk = min(kv_tile, _round_up(T, 8))
    T_p = _round_up(T, math.lcm(tq, tk))
    if T_p != T:
        # Padded key rows lie above the causal diagonal of every real query row,
        # so the mask removes them; padded query rows are sliced off below.
        qkv = jnp.pad(qkv, ((0, 0), (0, T_p - T), (0, 0)))

    sm_scale = 1.0 / math.sqrt(hd)
    nq = T_p // tq
    nk = T_p // tk

    def _last_needed(qi):
        # Largest kv block index that intersects the causal region of q-tile qi.
        return (qi * tq + tq - 1) // tk

    q_map = lambda b, g, qi, ki: (b, qi, g)
    k_map = lambda b, g, qi, ki: (b, jnp.minimum(ki, _last_needed(qi)), ng + g)
    v_map = lambda b, g, qi, ki: (b, jnp.minimum(ki, _last_needed(qi)), 2 * ng + g)
    o_map = lambda b, g, qi, ki: (b, qi, g)

    # Cost estimate (advisory): causal work only, KV re-reads accounted for.
    kv_tiles_fetched = sum(min((qi * tq + tq - 1) // tk, nk - 1) + 1
                           for qi in range(nq))
    itemsize = qkv.dtype.itemsize
    flops = 4 * B * n_head * kv_tiles_fetched * tq * tk * hd
    bytes_accessed = (B * ng * nq * tq * LW * itemsize
                      + 2 * B * ng * kv_tiles_fetched * tk * LW * itemsize
                      + B * T_p * C * jnp.dtype(out_dtype).itemsize)

    out = pl.pallas_call(
        functools.partial(_flash_attn_kernel, sm_scale=sm_scale, hd=hd, G=G),
        out_shape=jax.ShapeDtypeStruct((B, T_p, C), out_dtype),
        grid_spec=pltpu.PrefetchScalarGridSpec(
            num_scalar_prefetch=0,
            grid=(B, ng, nq, nk),
            in_specs=[
                pl.BlockSpec((1, tq, LW), q_map),   # Q column slab
                pl.BlockSpec((1, tk, LW), k_map),   # K column slab (diag-clamped)
                pl.BlockSpec((1, tk, LW), v_map),   # V column slab (diag-clamped)
            ],
            out_specs=pl.BlockSpec((1, tq, LW), o_map),
            scratch_shapes=[
                pltpu.VMEM((G, tq, 1), jnp.float32),   # running max (per head)
                pltpu.VMEM((G, tq, 1), jnp.float32),   # running denom (per head)
                pltpu.VMEM((G, tq, hd), jnp.float32),  # output accumulator
            ],
        ),
        compiler_params=pltpu.CompilerParams(
            dimension_semantics=("parallel", "parallel", "parallel", "arbitrary"),
            vmem_limit_bytes=32 * 1024 * 1024,   # explicit: fits v7x's 64 MiB/TC
        ),
        cost_estimate=pl.CostEstimate(
            flops=int(flops),
            transcendentals=int(B * n_head * T_p * T_p // 2),
            bytes_accessed=int(bytes_accessed),
        ),
    )(qkv, qkv, qkv)

    if T_p != T:
        out = out[:, :T, :]
    return out


# ------------------------------- full module ---------------------------------

def causal_self_attention_pallas(x, wqkv, bqkv, wproj, bproj, n_head, *,
                                 matmul_dtype=jnp.bfloat16,
                                 row_tile=256, col_tile=512,
                                 q_tile=256, kv_tile=256):
    """x: (B, T, C). wqkv: (C, 3C), bqkv: (3C,), wproj: (C, C), bproj: (C,)."""
    B, T, C = x.shape
    assert C % n_head == 0
    out_dtype = x.dtype

    # 1) QKV projection (bf16 MXU operands, f32 accumulation).
    x2 = x.reshape(B * T, C).astype(matmul_dtype)
    qkv = _linear_pallas(x2, wqkv.astype(matmul_dtype), bqkv,
                         row_tile=row_tile, col_tile=col_tile,
                         out_dtype=matmul_dtype)                     # (B*T, 3C)
    qkv = qkv.reshape(B, T, 3 * C)                                   # free reshape

    # 2) Causal attention reads Q/K/V straight from the QKV layout and writes
    #    (B, T, C) directly (no transposes through HBM).
    y = _flash_attention_pallas(qkv, n_head, q_tile=q_tile, kv_tile=kv_tile,
                                out_dtype=matmul_dtype)              # (B, T, C)

    # 3) Output projection.
    out = _linear_pallas(y.reshape(B * T, C), wproj.astype(matmul_dtype),
                         bproj, row_tile=row_tile, col_tile=col_tile,
                         out_dtype=out_dtype)
    return out.reshape(B, T, C)


# ------------------------------- reference -----------------------------------

def causal_self_attention_reference(x, wqkv, bqkv, wproj, bproj, n_head):
    B, T, C = x.shape
    hd = C // n_head
    hp = jax.lax.Precision.HIGHEST
    qkv = jnp.matmul(x, wqkv, precision=hp) + bqkv
    q, k, v = jnp.split(qkv, 3, axis=-1)
    q = q.reshape(B, T, n_head, hd).transpose(0, 2, 1, 3)
    k = k.reshape(B, T, n_head, hd).transpose(0, 2, 1, 3)
    v = v.reshape(B, T, n_head, hd).transpose(0, 2, 1, 3)
    att = jnp.matmul(q, jnp.swapaxes(k, -1, -2), precision=hp) / math.sqrt(hd)
    mask = jnp.tril(jnp.ones((T, T), dtype=bool))
    att = jnp.where(mask[None, None], att, -jnp.inf)
    att = jax.nn.softmax(att, axis=-1)
    y = jnp.matmul(att, v, precision=hp)
    y = y.transpose(0, 2, 1, 3).reshape(B, T, C)
    return jnp.matmul(y, wproj, precision=hp) + bproj


if __name__ == "__main__":
    def run_case(B, T, C, n_head, key):
        kx, kw1, kb1, kw2, kb2 = jax.random.split(key, 5)
        x = jax.random.normal(kx, (B, T, C), dtype=jnp.float32)
        # PyTorch Linear stores (out, in); weights here are kept as (in, out).
        wqkv = jax.random.normal(kw1, (C, 3 * C), dtype=jnp.float32) / math.sqrt(C)
        bqkv = jax.random.normal(kb1, (3 * C,), dtype=jnp.float32) * 0.01
        wproj = jax.random.normal(kw2, (C, C), dtype=jnp.float32) / math.sqrt(C)
        bproj = jax.random.normal(kb2, (C,), dtype=jnp.float32) * 0.01

        ref = causal_self_attention_reference(x, wqkv, bqkv, wproj, bproj, n_head)
        out = causal_self_attention_pallas(x, wqkv, bqkv, wproj, bproj, n_head)
        out = jax.block_until_ready(out)
        assert out.shape == (B, T, C)
        rel = jnp.linalg.norm(out.astype(jnp.float32) - ref) / jnp.linalg.norm(ref)
        assert rel < 5e-2, (
            f"relative error too large: {rel} (B={B}, T={T}, C={C}, H={n_head})")

    key = jax.random.PRNGKey(0)
    k1, k2 = jax.random.split(key)
    # hd=32 -> 4 heads per 128-lane group.
    run_case(2, 32, 128, 4, k1)
    # hd=64 -> 2 heads per group; T=20 exercises sequence padding.
    run_case(1, 20, 128, 2, k2)
    print("KERNEL_OK")
</pallas_src>

<mosaic_0001>
module attributes {stable_mosaic.version = 11 : i64} {
  func.func @_linear_kernel(%arg0: i32, %arg1: i32, %arg2: memref<64x128xbf16, #tpu.memory_space<vmem>>, %arg3: memref<128x384xbf16, #tpu.memory_space<vmem>>, %arg4: memref<1x384xf32, #tpu.memory_space<vmem>>, %arg5: memref<64x384xbf16, #tpu.memory_space<vmem>>) attributes {dimension_semantics = [#tpu.dimension_semantics<parallel>, #tpu.dimension_semantics<parallel>], iteration_bounds = array<i64: 1, 1>, scalar_prefetch = 0 : i64, scratch_operands = 0 : i64, tpu.core_type = #tpu.core_type<tc>, window_params = [{transform_indices = @transform_0, window_bounds = array<i64: 64, 128>}, {transform_indices = @transform_1, window_bounds = array<i64: 128, 384>}, {transform_indices = @transform_2, window_bounds = array<i64: 1, 384>}, {transform_indices = @transform_3, window_bounds = array<i64: 64, 384>}]} {
    %c0 = arith.constant 0 : index
    %c0_0 = arith.constant 0 : index
    %0 = vector.load %arg2[%c0, %c0_0] : memref<64x128xbf16, #tpu.memory_space<vmem>>, vector<64x128xbf16>
    %c0_1 = arith.constant 0 : index
    %c0_2 = arith.constant 0 : index
    %1 = vector.load %arg3[%c0_1, %c0_2] : memref<128x384xbf16, #tpu.memory_space<vmem>>, vector<128x384xbf16>
    %cst = arith.constant dense<0.000000e+00> : vector<64x384xf32>
    %2 = tpu.matmul %0, %1, %cst {dimension_numbers = #tpu.dot_dimension_numbers<[1], [0], [0], [1], [0, 0, 1, 1], [], []>} : vector<64x128xbf16>, vector<128x384xbf16>, vector<64x384xf32> -> vector<64x384xf32>
    %c0_3 = arith.constant 0 : index
    %c0_4 = arith.constant 0 : index
    %3 = vector.load %arg4[%c0_3, %c0_4] : memref<1x384xf32, #tpu.memory_space<vmem>>, vector<1x384xf32>
    %4 = vector.broadcast %3 : vector<1x384xf32> to vector<64x384xf32>
    %5 = arith.addf %2, %4 : vector<64x384xf32>
    %6 = arith.truncf %5 : vector<64x384xf32> to vector<64x384xbf16>
    %c0_5 = arith.constant 0 : index
    %c0_6 = arith.constant 0 : index
    %7 = vector.load %arg5[%c0_5, %c0_6] : memref<64x384xbf16, #tpu.memory_space<vmem>>, vector<64x384xbf16>
    tpu.vector_store %arg5[%c0_5, %c0_6], %6 {strides = array<i32>} : memref<64x384xbf16, #tpu.memory_space<vmem>>, vector<64x384xbf16>,
    return
  }
  func.func @transform_0(%arg0: i32, %arg1: i32) -> (i32, i32) {
    %c0_i32 = arith.constant 0 : i32
    %c0_i32_0 = arith.constant 0 : i32
    return %arg0, %c0_i32 : i32, i32
  }
  func.func @transform_1(%arg0: i32, %arg1: i32) -> (i32, i32) {
    %c0_i32 = arith.constant 0 : i32
    %c0_i32_0 = arith.constant 0 : i32
    return %c0_i32, %arg1 : i32, i32
  }
  func.func @transform_2(%arg0: i32, %arg1: i32) -> (i32, i32) {
    %c0_i32 = arith.constant 0 : i32
    %c0_i32_0 = arith.constant 0 : i32
    return %c0_i32, %arg1 : i32, i32
  }
  func.func @transform_3(%arg0: i32, %arg1: i32) -> (i32, i32) {
    %c0_i32 = arith.constant 0 : i32
    return %arg0, %arg1 : i32, i32
  }
}

</mosaic_0001>

<bundles_post_ra>
// kernel: tpu_custom_call.1
= control target key start
LH: loop header
LB: loop body
LE: loop exit
PB: predicated region body
PF: predicated region fallthrough
CT: control target
= control target key end

     0   :  { %8 = vsyncpa [#allocation3], 0  ;;  %s733_s0 = inlined_call_operand.hbm [shape: bf16[64,128], index: 0, kind: input, shape index: {}]   ;;  %s734_s1 = inlined_call_operand.hbm [shape: bf16[128,384], index: 1, kind: input, shape index: {}]   ;;  %s735_s2 = inlined_call_operand.hbm [shape: f32[1,384], index: 2, kind: input, shape index: {}]   ;;  %s736_s3 = inlined_call_operand.hbm [shape: bf16[64,384], index: 3, kind: output, shape index: {}]  }
   0x1   :  { %9 = vsyncpa [#allocation6], 0  ;;  %s28_s14 = sshll.u32 %s734_s1, 4  ;;  %s29_s14 = int_to_ptr.hbm [resolvable:$true] %s28_s14 }
   0x2   :  { %10 = vsyncpa [#allocation4], 0  ;;  %s657_s15 = smov [#allocation5]   ;;  %s15_s19 = sshll.u32 %s733_s0, 4  ;;  %s16_s19 = int_to_ptr.hbm [resolvable:$true] %s15_s19 }
   0x3   :  { %s30_s16 = sshll.u32 %s657_s15, 4  ;;  %s658_s20 = smov 192   ;;  %s31_s16 = int_to_ptr.vmem [resolvable:$true] %s30_s16 }
   0x4   :  { %s659_s21 = smov 12   ;;  %s660_s22 = smov [#allocation2]  }
   0x5   :  { %36 = dma.hbm_to_vmem [thread:$0]  %s29_s14, 3072, %s31_s16, [#allocation6], %s658_s20, %s658_s20, %s659_s21  }
   0x6   :  { %s17_s23 = sshll.u32 %s660_s22, 4  ;;  %s661_s1 = smov 64   ;;  %s18_s23 = int_to_ptr.vmem [resolvable:$true] %s17_s23 }
   0x7   :  { %s662_s24 = smov 4   ;;  %s42_s27 = sshll.u32 %s735_s2, 4  ;;  %s43_s27 = int_to_ptr.hbm [resolvable:$true] %s42_s27 }
   0x8   :  { %23 = dma.hbm_to_vmem [thread:$0]  %s16_s19, 512, %s18_s23, [#allocation3], %s661_s1, %s661_s1, %s662_s24  }
   0x9   :  { %s663_s28 = smov [#allocation7]  }
   0xa   :  { %s44_s0 = sshll.u32 %s663_s28, 4  ;;  %s45_s0 = int_to_ptr.vmem [resolvable:$true] %s44_s0 }
   0xb   :  { %47 = dma.hbm_to_vmem [thread:$0]  %s43_s27, 48, %s45_s0, [#allocation6]  }
   0xc   :  { %651 = dma.done.wait [#allocation3], 512  }
   0xd   :  { %652 = vsyncadd [#allocation3], 4294966784 }
   0xe   :  { %653 = dma.done.wait [#allocation6], 3120  }
   0xf   :  { %654 = vsyncadd [#allocation6], 4294964176  ;;  %v501_v0 = vld [vmem:[#allocation5 + $0xa8] sm:$0xf]  ;;  %v537_v1 = vld [vmem:[#allocation5 + $0xb0] sm:$0xf0] }
  0x10   :  { %v536_v2 = vld [vmem:[#allocation5 + $0xac] sm:$0xf]  ;;  %v502_v3 = vor.u32 %v537_v1, %v501_v0  ;;  %v503_v4 = vld [vmem:[#allocation5 + $0xb4] sm:$0xf0]  ;;  %v509_v5 = vld [vmem:[#allocation5 + $0xb0] sm:$0xf] }
  0x11   :  { %v538_v6 = vld [vmem:[#allocation5 + $0xb8] sm:$0xf0]  ;;  %v506_v7 = vor.u32 %v536_v2, %v503_v4  ;;  %v489_v9 = vld [vmem:[#allocation5 + $0x90] sm:$0xf]  ;;  %v533_v11 = vld [vmem:[#allocation5 + $0x94] sm:$0xf] }
  0x12   :  { %v510_v8 = vor.u32 %v538_v6, %v509_v5  ;;  %v534_v10 = vld [vmem:[#allocation5 + $0x98] sm:$0xf0]  ;;  %260 = vmatpush.bf16.msra.mxu0 %v502_v3  ;;  %v491_v13 = vld [vmem:[#allocation5 + $0x9c] sm:$0xf0]  ;;  %v497_v14 = vld [vmem:[#allocation5 + $0x98] sm:$0xf]  ;;  %539 = vmatpush.bf16.msra.mxu3 %v502_v3 }
  0x13   :  { %v490_v12 = vor.u32 %v534_v10, %v489_v9  ;;  %v535_v15 = vld [vmem:[#allocation5 + $0xa0] sm:$0xf0]  ;;  %289 = vmatpush.bf16.msra.mxu1 %v506_v7  ;;  %v494_v16 = vor.u32 %v533_v11, %v491_v13  ;;  %v477_v18 = vld [vmem:[#allocation5 + $0x78] sm:$0xf]  ;;  %v530_v20 = vld [vmem:[#allocation5 + $0x7c] sm:$0xf] }
  0x14   :  { %318 = vmatpush.bf16.msra.mxu2 %v510_v8  ;;  %v498_v17 = vor.u32 %v535_v15, %v497_v14  ;;  %v531_v19 = vld [vmem:[#allocation5 + $0x80] sm:$0xf0]  ;;  %v479_v21 = vld [vmem:[#allocation5 + $0x84] sm:$0xf0]  ;;  %v485_v22 = vld [vmem:[#allocation5 + $0x80] sm:$0xf] }
  0x15   :  { %v532_v23 = vld [vmem:[#allocation5 + $0x88] sm:$0xf0]  ;;  %v478_v24 = vor.u32 %v531_v19, %v477_v18  ;;  %v482_v25 = vor.u32 %v530_v20, %v479_v21  ;;  %v465_v27 = vld [vmem:[#allocation5 + $0x60] sm:$0xf]  ;;  %v527_v29 = vld [vmem:[#allocation5 + $0x64] sm:$0xf] }
  0x16   :  { %261 = vmatpush.bf16.msra.mxu0 %v490_v12  ;;  %540 = vmatpush.bf16.msra.mxu3 %v490_v12  ;;  %v486_v26 = vor.u32 %v532_v23, %v485_v22  ;;  %v528_v28 = vld [vmem:[#allocation5 + $0x68] sm:$0xf0]  ;;  %v467_v30 = vld [vmem:[#allocation5 + $0x6c] sm:$0xf0]  ;;  %v473_v31 = vld [vmem:[#allocation5 + $0x68] sm:$0xf] }
  0x17   :  { %290 = vmatpush.bf16.msra.mxu1 %v494_v16  ;;  %v529_v32 = vld [vmem:[#allocation5 + $0x70] sm:$0xf0]  ;;  %v466_v33 = vor.u32 %v528_v28, %v465_v27  ;;  %v470_v34 = vor.u32 %v527_v29, %v467_v30  ;;  %v453_v36 = vld [vmem:[#allocation5 + $0x48] sm:$0xf]  ;;  %v524_v38 = vld [vmem:[#allocation5 + $0x4c] sm:$0xf] }
  0x18   :  { %319 = vmatpush.bf16.msra.mxu2 %v498_v17  ;;  %v474_v35 = vor.u32 %v529_v32, %v473_v31  ;;  %v525_v37 = vld [vmem:[#allocation5 + $0x50] sm:$0xf0]  ;;  %v455_v39 = vld [vmem:[#allocation5 + $0x54] sm:$0xf0]  ;;  %v461_v40 = vld [vmem:[#allocation5 + $0x50] sm:$0xf] }
  0x19   :  { %v526_v41 = vld [vmem:[#allocation5 + $0x58] sm:$0xf0]  ;;  %v454_v42 = vor.u32 %v525_v37, %v453_v36  ;;  %v458_v43 = vor.u32 %v524_v38, %v455_v39  ;;  %v441_v45 = vld [vmem:[#allocation5 + $0x30] sm:$0xf]  ;;  %v521_v47 = vld [vmem:[#allocation5 + $0x34] sm:$0xf] }
  0x1a   :  { %262 = vmatpush.bf16.msra.mxu0 %v478_v24  ;;  %541 = vmatpush.bf16.msra.mxu3 %v478_v24  ;;  %v462_v44 = vor.u32 %v526_v41, %v461_v40  ;;  %v522_v46 = vld [vmem:[#allocation5 + $0x38] sm:$0xf0]  ;;  %v443_v48 = vld [vmem:[#allocation5 + $0x3c] sm:$0xf0]  ;;  %v449_v49 = vld [vmem:[#allocation5 + $0x38] sm:$0xf] }
  0x1b   :  { %291 = vmatpush.bf16.msra.mxu1 %v482_v25  ;;  %v523_v50 = vld [vmem:[#allocation5 + $0x40] sm:$0xf0]  ;;  %v442_v51 = vor.u32 %v522_v46, %v441_v45  ;;  %v446_v52 = vor.u32 %v521_v47, %v443_v48  ;;  %v429_v54 = vld [vmem:[#allocation5 + $0x18] sm:$0xf]  ;;  %v518_v56 = vld [vmem:[#allocation5 + $0x1c] sm:$0xf] }
  0x1c   :  { %320 = vmatpush.bf16.msra.mxu2 %v486_v26  ;;  %v450_v53 = vor.u32 %v523_v50, %v449_v49  ;;  %v519_v55 = vld [vmem:[#allocation5 + $0x20] sm:$0xf0]  ;;  %v431_v57 = vld [vmem:[#allocation5 + $0x24] sm:$0xf0]  ;;  %v437_v58 = vld [vmem:[#allocation5 + $0x20] sm:$0xf] }
  0x1d   :  { %v520_v59 = vld [vmem:[#allocation5 + $0x28] sm:$0xf0]  ;;  %v430_v60 = vor.u32 %v519_v55, %v429_v54  ;;  %v434_v61 = vor.u32 %v518_v56, %v431_v57  ;;  %v417_v63 = vld [vmem:[#allocation5] sm:$0xf]  ;;  %v515_v1 = vld [vmem:[#allocation5 + $0x4] sm:$0xf] }
  0x1e   :  { %263 = vmatpush.bf16.msra.mxu0 %v466_v33  ;;  %542 = vmatpush.bf16.msra.mxu3 %v466_v33  ;;  %v438_v62 = vor.u32 %v520_v59, %v437_v58  ;;  %v516_v0 = vld [vmem:[#allocation5 + $0x8] sm:$0xf0]  ;;  %v419_v2 = vld [vmem:[#allocation5 + $0xc] sm:$0xf0]  ;;  %v425_v3 = vld [vmem:[#allocation5 + $0x8] sm:$0xf] }
  0x1f   :  { %292 = vmatpush.bf16.msra.mxu1 %v470_v34  ;;  %v517_v4 = vld [vmem:[#allocation5 + $0x10] sm:$0xf0]  ;;  %v418_v5 = vor.u32 %v516_v0, %v417_v63  ;;  %v422_v6 = vor.u32 %v515_v1, %v419_v2  ;;  %v511_v8 = vld [vmem:[#allocation2] sm:$0xff]  ;;  %v512_v9 = vld [vmem:[#allocation2 + $0x8] sm:$0xff]  ;;  %s664_s2 = smov [#allocation8]   ;;  %s385_s5 = sshll.u32 %s736_s3, 4  ;;  %s386_s5 = int_to_ptr.hbm [resolvable:$true] %s385_s5 }
  0x20   :  { %321 = vmatpush.bf16.msra.mxu2 %v474_v35  ;;  %v426_v7 = vor.u32 %v517_v4, %v425_v3  ;;  %v513_v10 = vld [vmem:[#allocation2 + $0x10] sm:$0xff]  ;;  %v514_v11 = vld [vmem:[#allocation2 + $0x18] sm:$0xff]  ;;  %v100_v12 = vld [vmem:[#allocation7] sm:$0x7]  ;;  %s383_s29 = sshll.u32 %s664_s2, 4  ;;  %s384_s29 = int_to_ptr.vmem [resolvable:$true] %s383_s29 }
  0x21   :  { %v697_v13 = vperm.slane %v100_v12, 0  ;;  %v699_v14 = vperm.slane %v100_v12, 1  ;;  %v703_v20 = vperm.slane %v100_v12, 2 }
  0x22   :  { %264 = vmatpush.bf16.msra.mxu0 %v454_v42  ;;  %543 = vmatpush.bf16.msra.mxu3 %v454_v42 }
  0x23   :  { %293 = vmatpush.bf16.msra.mxu1 %v458_v43 }
  0x24   :  { %322 = vmatpush.bf16.msra.mxu2 %v462_v44 }
  0x26   :  { %265 = vmatpush.bf16.msra.mxu0 %v442_v51  ;;  %544 = vmatpush.bf16.msra.mxu3 %v442_v51 }
  0x27   :  { %294 = vmatpush.bf16.msra.mxu1 %v446_v52 }
  0x28   :  { %323 = vmatpush.bf16.msra.mxu2 %v450_v53 }
  0x2a   :  { %266 = vmatpush.bf16.msra.mxu0 %v430_v60  ;;  %545 = vmatpush.bf16.msra.mxu3 %v430_v60 }
  0x2b   :  { %295 = vmatpush.bf16.msra.mxu1 %v434_v61 }
  0x2c   :  { %324 = vmatpush.bf16.msra.mxu2 %v438_v62 }
  0x2e   :  { %267 = vmatpush.bf16.msra.mxu0 %v418_v5  ;;  %546 = vmatpush.bf16.msra.mxu3 %v418_v5 }
  0x2f   :  { %296 = vmatpush.bf16.msra.mxu1 %v422_v6 }
  0x30   :  { %325 = vmatpush.bf16.msra.mxu2 %v426_v7 }
  0x31   :  { %268 = vmatmul.bf16.vlgmr.msra.gmra.mxu0 %v511_v8  ;;  %273 = vmatmul.bf16.vlgmr.msra.gmra.mxu3 %v512_v9 }
  0x32   :  { %297 = vmatmul.bf16.vlgmr.msra.gmra.mxu1 %v511_v8 }
  0x33   :  { %326 = vmatmul.bf16.vlgmr.msra.gmra.mxu2 %v511_v8 }
  0x41   :  { %278 = vmatmul.bf16.gmra.mxu3 %v513_v10 }
  0x42   :  { %302 = vmatmul.bf16.gmra.mxu1 %v512_v9 }
  0x43   :  { %331 = vmatmul.bf16.gmra.mxu2 %v512_v9 }
  0x51   :  { %283 = vmatmul.bf16.gmra.mxu3 %v514_v11 }
  0x52   :  { %307 = vmatmul.bf16.gmra.mxu1 %v513_v10 }
  0x53   :  { %336 = vmatmul.bf16.gmra.mxu2 %v513_v10 }
  0x62   :  { %312 = vmatmul.bf16.gmra.mxu1 %v514_v11 }
  0x63   :  { %341 = vmatmul.bf16.gmra.mxu2 %v514_v11 }
  0xae   :  { %v269_v15 = vpop.f32.mrf.mxu0 }
  0xaf   :  { %v270_v16 = vadd.f32 %v269_v15, %v697_v13  ;;  %v298_v17 = vpop.f32.mrf.mxu1 }
  0xb0   :  { %v299_v18 = vadd.f32 %v298_v17, %v699_v14 }
  0xb2   :  { %v347_v19 = vpack.c.bf16 %v299_v18, %v270_v16 }
  0xb4   :  { %363 = vst [vmem:[#allocation8] sm:$0xff] %v347_v19  ;;  %v274_v21 = vpop.f32.mrf.mxu3 }
  0xb5   :  { %v275_v32 = vadd.f32 %v274_v21, %v697_v13 }
  0xb6   :  { %v327_v22 = vpop.f32.mrf.mxu2  ;;  %v271_v24 = vpop.f32.mrf.mxu0 }
  0xb7   :  { %v328_v23 = vadd.f32 %v327_v22, %v703_v20  ;;  %v272_v25 = vadd.f32 %v271_v24, %v697_v13  ;;  %v300_v26 = vpop.f32.mrf.mxu1 }
  0xb8   :  { %v301_v28 = vadd.f32 %v300_v26, %v699_v14 }
  0xb9   :  { %v348_v27 = vpack.c.bf16 %v328_v23, %v328_v23 }
  0xba   :  { %v349_v29 = vpack.c.bf16 %v301_v28, %v272_v25 }
  0xbb   :  { %364 = vst [vmem:[#allocation8 + $0x8] sm:$0xf] %v348_v27 }
  0xbc   :  { %365 = vst [vmem:[#allocation8 + $0xc] sm:$0xff] %v349_v29  ;;  %v276_v31 = vpop.f32.mrf.mxu3 }
  0xbd   :  { %v277_v42 = vadd.f32 %v276_v31, %v697_v13 }
  0xbe   :  { %v329_v30 = vpop.f32.mrf.mxu2 }
  0xbf   :  { %v330_v33 = vadd.f32 %v329_v30, %v703_v20  ;;  %v303_v34 = vpop.f32.mrf.mxu1 }
  0xc0   :  { %v304_v36 = vadd.f32 %v303_v34, %v699_v14 }
  0xc1   :  { %v350_v35 = vpack.c.bf16 %v330_v33, %v330_v33 }
  0xc2   :  { %v351_v37 = vpack.c.bf16 %v304_v36, %v275_v32 }
  0xc3   :  { %366 = vst [vmem:[#allocation8 + $0x14] sm:$0xf] %v350_v35 }
  0xc4   :  { %367 = vst [vmem:[#allocation8 + $0x18] sm:$0xff] %v351_v37  ;;  %v279_v41 = vpop.f32.mrf.mxu3 }
  0xc5   :  { %v280_v47 = vadd.f32 %v279_v41, %v697_v13 }
  0xc6   :  { %v332_v38 = vpop.f32.mrf.mxu2 }
  0xc7   :  { %v333_v39 = vadd.f32 %v332_v38, %v703_v20  ;;  %v305_v40 = vpop.f32.mrf.mxu1 }
  0xc8   :  { %v306_v44 = vadd.f32 %v305_v40, %v699_v14 }
  0xc9   :  { %v352_v43 = vpack.c.bf16 %v333_v39, %v333_v39 }
  0xca   :  { %v353_v45 = vpack.c.bf16 %v306_v44, %v277_v42 }
  0xcb   :  { %368 = vst [vmem:[#allocation8 + $0x20] sm:$0xf] %v352_v43 }
  0xcc   :  { %369 = vst [vmem:[#allocation8 + $0x24] sm:$0xff] %v353_v45  ;;  %v281_v52 = vpop.f32.mrf.mxu3 }
  0xcd   :  { %v282_v57 = vadd.f32 %v281_v52, %v697_v13 }
  0xce   :  { %v334_v46 = vpop.f32.mrf.mxu2 }
  0xcf   :  { %v335_v48 = vadd.f32 %v334_v46, %v703_v20  ;;  %v308_v49 = vpop.f32.mrf.mxu1 }
  0xd0   :  { %v309_v51 = vadd.f32 %v308_v49, %v699_v14 }
  0xd1   :  { %v354_v50 = vpack.c.bf16 %v335_v48, %v335_v48 }
  0xd2   :  { %v355_v53 = vpack.c.bf16 %v309_v51, %v280_v47 }
  0xd3   :  { %370 = vst [vmem:[#allocation8 + $0x2c] sm:$0xf] %v354_v50 }
  0xd4   :  { %371 = vst [vmem:[#allocation8 + $0x30] sm:$0xff] %v355_v53  ;;  %v284_v61 = vpop.f32.mrf.mxu3 }
  0xd5   :  { %v285_v63 = vadd.f32 %v284_v61, %v697_v13 }
  0xd6   :  { %v337_v54 = vpop.f32.mrf.mxu2 }
  0xd7   :  { %v338_v55 = vadd.f32 %v337_v54, %v703_v20  ;;  %v310_v56 = vpop.f32.mrf.mxu1 }
  0xd8   :  { %v311_v59 = vadd.f32 %v310_v56, %v699_v14 }
  0xd9   :  { %v356_v58 = vpack.c.bf16 %v338_v55, %v338_v55 }
  0xda   :  { %v357_v60 = vpack.c.bf16 %v311_v59, %v282_v57 }
  0xdb   :  { %372 = vst [vmem:[#allocation8 + $0x38] sm:$0xf] %v356_v58 }
  0xdc   :  { %373 = vst [vmem:[#allocation8 + $0x3c] sm:$0xff] %v357_v60  ;;  %v286_v5 = vpop.f32.mrf.mxu3 }
  0xdd   :  { %v287_v9 = vadd.f32 %v286_v5, %v697_v13 }
  0xde   :  { %v339_v62 = vpop.f32.mrf.mxu2 }
  0xdf   :  { %v340_v0 = vadd.f32 %v339_v62, %v703_v20  ;;  %v313_v1 = vpop.f32.mrf.mxu1 }
  0xe0   :  { %v314_v3 = vadd.f32 %v313_v1, %v699_v14 }
  0xe1   :  { %v358_v2 = vpack.c.bf16 %v340_v0, %v340_v0 }
  0xe2   :  { %v359_v4 = vpack.c.bf16 %v314_v3, %v285_v63 }
  0xe3   :  { %374 = vst [vmem:[#allocation8 + $0x44] sm:$0xf] %v358_v2 }
  0xe4   :  { %375 = vst [vmem:[#allocation8 + $0x48] sm:$0xff] %v359_v4 }
  0xe6   :  { %v342_v6 = vpop.f32.mrf.mxu2 }
  0xe7   :  { %v343_v7 = vadd.f32 %v342_v6, %v703_v20  ;;  %v315_v8 = vpop.f32.mrf.mxu1 }
  0xe8   :  { %v316_v11 = vadd.f32 %v315_v8, %v699_v14 }
  0xe9   :  { %v360_v10 = vpack.c.bf16 %v343_v7, %v343_v7 }
  0xea   :  { %v361_v12 = vpack.c.bf16 %v316_v11, %v287_v9 }
  0xeb   :  { %376 = vst [vmem:[#allocation8 + $0x50] sm:$0xf] %v360_v10 }
  0xec   :  { %377 = vst [vmem:[#allocation8 + $0x54] sm:$0xff] %v361_v12 }
  0xee   :  { %v344_v15 = vpop.f32.mrf.mxu2 }
  0xef   :  { %v345_v16 = vadd.f32 %v344_v15, %v703_v20 }
  0xf1   :  { %v362_v17 = vpack.c.bf16 %v345_v16, %v345_v16 }
  0xf3   :  { %378 = vst [vmem:[#allocation8 + $0x5c] sm:$0xf] %v362_v17 }
  0xf4   :  { %391 = dma.vmem_to_hbm [thread:$0]  %s384_s29, 1536, %s386_s5, [#allocation4], %s658_s20, %s658_s20, %s659_s21  }
  0xf5   :  { %655 = dma.done.wait [#allocation4], 1536  }
  0xf6   :  { %656 = vsyncadd [#allocation4], 4294965760 }
  0xf7   :  { %396 = vsyncpa [#allocation3], 1 }
  0xf8   :  { %397 = vsyncpa [#allocation6], 1 }
  0xf9   :  { %398 = vsyncpa [#allocation4], 1 }

</bundles_post_ra>
